<compile_context>
chip_gen: v5e
topology: v5e:2x2
jax: 0.10.0
libtpu: 0.0.40
codegen_flags: <defaults>
</compile_context>

<pallas_src>
import functools
import math

import jax
import jax.numpy as jnp
from jax.experimental import pallas as pl
from jax.experimental.pallas import tpu as pltpu


# ----------------------------------------------------------------------------
# tile-size helpers
# ----------------------------------------------------------------------------
def _pick_tile(dim: int, target: int, align: int) -> int:
    """Largest block <= target that divides dim, preferring multiples of align."""
    if dim <= target:
        return dim
    t = (target // align) * align
    while t >= align:
        if dim % t == 0:
            return t
        t -= align
    for t in range(min(target, dim), 0, -1):
        if dim % t == 0:
            return t
    return dim


# ----------------------------------------------------------------------------
# RelativePosition kernel
# ----------------------------------------------------------------------------
def _relpos_kernel(table_ref, out_ref, *, max_rel: int, lk: int, n: int, tq: int):
    # out_ref: (tq, lk*n) lane-dense tile covering q rows [i*tq, (i+1)*tq).
    t = table_ref.shape[0]                     # 2*max_rel + 1 (small)
    q0 = pl.program_id(0) * tq

    # idx computed once per tile, reused across the whole lane dimension.
    rows = jax.lax.broadcasted_iota(jnp.int32, (tq, lk * n), 0) + q0   # q index
    cols = jax.lax.broadcasted_iota(jnp.int32, (tq, lk * n), 1)
    kpos = cols // n                                                   # k index
    idx = jnp.clip(kpos - rows, -max_rel, max_rel) + max_rel           # in [0, t)

    # tiled[j, k*n + u] == table[j, u]  (hoisted once; no MXU, no one-hot)
    tiled = jnp.tile(table_ref[...], (1, lk))                          # (t, lk*n)

    acc = jnp.zeros((tq, lk * n), jnp.float32)
    for j in range(t):                          # t is tiny; unrolled VPU selects
        acc = jnp.where(idx == j, tiled[j][None, :], acc)
    out_ref[...] = acc.astype(out_ref.dtype)


def relative_position(table: jax.Array, length_q: int, length_k: int,
                      max_rel: int) -> jax.Array:
    """table: (2*max_rel+1, num_units) -> (length_q, length_k, num_units)."""
    t, n = table.shape
    assert t == 2 * max_rel + 1
    lane = length_k * n                         # lane-dense last dim

    # Cap the output tile at ~2 MiB so (double-buffered) it stays well inside the
    # default scoped VMEM limit on all chips (v5e 16 MiB / v6e 32 MiB / v7x 32 MiB).
    target_rows = max(8, (2 << 20) // max(1, lane * 4))
    tq = _pick_tile(length_q, target_rows, 8)

    out2d = pl.pallas_call(
        functools.partial(_relpos_kernel, max_rel=max_rel, lk=length_k, n=n, tq=tq),
        out_shape=jax.ShapeDtypeStruct((length_q, lane), table.dtype),
        grid=(length_q // tq,),
        in_specs=[pl.BlockSpec((t, n), lambda i: (0, 0))],       # table stays resident
        out_specs=pl.BlockSpec((tq, lane), lambda i: (i, 0)),    # lane-dense stores
        compiler_params=pltpu.CompilerParams(
            dimension_semantics=("parallel",)),                  # megacore
    )(table)
    # Same bytes; reshape to the 3-D view outside the kernel.
    return out2d.reshape(length_q, length_k, n)


# ----------------------------------------------------------------------------
# LayerNorm kernel
# ----------------------------------------------------------------------------
def _layernorm_kernel(x_ref, g_ref, b_ref, o_ref, *, eps: float):
    x = x_ref[...].astype(jnp.float32)
    mu = jnp.mean(x, axis=-1, keepdims=True)
    xc = x - mu
    var = jnp.mean(xc * xc, axis=-1, keepdims=True)
    inv = jax.lax.rsqrt(var + eps)
    o_ref[...] = (xc * inv * g_ref[...] + b_ref[...]).astype(o_ref.dtype)


def layer_norm(x2d: jax.Array, gamma: jax.Array, beta: jax.Array,
               eps: float = 1e-5) -> jax.Array:
    m, c = x2d.shape
    tr = _pick_tile(m, max(8, (1 << 20) // max(1, c * 4)), 8)
    return pl.pallas_call(
        functools.partial(_layernorm_kernel, eps=eps),
        out_shape=jax.ShapeDtypeStruct((m, c), x2d.dtype),
        grid=(m // tr,),
        in_specs=[pl.BlockSpec((tr, c), lambda i: (i, 0)),
                  pl.BlockSpec((1, c), lambda i: (0, 0)),
                  pl.BlockSpec((1, c), lambda i: (0, 0))],
        out_specs=pl.BlockSpec((tr, c), lambda i: (i, 0)),
        compiler_params=pltpu.CompilerParams(dimension_semantics=("parallel",)),
    )(x2d, gamma.reshape(1, c), beta.reshape(1, c))


# ----------------------------------------------------------------------------
# Linear (matmul + bias) kernel
# ----------------------------------------------------------------------------
def _linear_kernel(x_ref, w_ref, b_ref, o_ref, acc_ref):
    @pl.when(pl.program_id(2) == 0)
    def _():
        acc_ref[...] = jnp.zeros_like(acc_ref)

    acc_ref[...] += jnp.dot(x_ref[...], w_ref[...],
                            preferred_element_type=jnp.float32)

    @pl.when(pl.program_id(2) == pl.num_programs(2) - 1)
    def _():
        o_ref[...] = (acc_ref[...] + b_ref[...].astype(jnp.float32)
                      ).astype(o_ref.dtype)


def linear(x: jax.Array, w: jax.Array, b: jax.Array | None = None) -> jax.Array:
    m, k = x.shape
    k2, n = w.shape
    assert k == k2
    if b is None:
        b = jnp.zeros((n,), x.dtype)
    tm = _pick_tile(m, 256, 8)
    tn = _pick_tile(n, 256, 128)
    tk = _pick_tile(k, 512, 128)
    return pl.pallas_call(
        _linear_kernel,
        out_shape=jax.ShapeDtypeStruct((m, n), x.dtype),
        grid=(m // tm, n // tn, k // tk),
        in_specs=[pl.BlockSpec((tm, tk), lambda i, j, kk: (i, kk)),
                  pl.BlockSpec((tk, tn), lambda i, j, kk: (kk, j)),
                  pl.BlockSpec((1, tn), lambda i, j, kk: (0, j))],
        out_specs=pl.BlockSpec((tm, tn), lambda i, j, kk: (i, j)),
        scratch_shapes=[pltpu.VMEM((tm, tn), jnp.float32)],
        compiler_params=pltpu.CompilerParams(
            dimension_semantics=("parallel", "parallel", "arbitrary")),
    )(x, w, b.reshape(1, n))


# ----------------------------------------------------------------------------
# Fused relative self-attention kernel (one grid step per (batch, head))
# ----------------------------------------------------------------------------
def _rel_attn_kernel(q_ref, k_ref, v_ref, m_ref, rk_ref, rvt_ref, o_ref, *,
                     scale: float):
    q = q_ref[0].astype(jnp.float32)            # (T, d)
    k = k_ref[0].astype(jnp.float32)            # (T, d)
    v = v_ref[0].astype(jnp.float32)            # (T, d)

    # attn1 = q @ k^T  (MXU)
    attn1 = jax.lax.dot_general(q, k, (((1,), (1,)), ((), ())),
                                preferred_element_type=jnp.float32)      # (T, T)
    # attn2[i, j] = sum_d q[i, d] * rel_k[i, j, d]   (lane-dim reduce, VPU/XLU)
    attn2 = jnp.sum(q[:, None, :] * rk_ref[...].astype(jnp.float32), axis=-1)

    attn = (attn1 + attn2) * scale
    attn = jnp.where(m_ref[0] > 0.5, attn, -1e30)                        # mask

    amax = jnp.max(attn, axis=-1, keepdims=True)
    p = jnp.exp(attn - amax)
    p = p * pl.reciprocal(jnp.sum(p, axis=-1, keepdims=True), approx=False)

    w1 = jnp.dot(p, v, preferred_element_type=jnp.float32)               # (T, d)
    # w2[i, d] = sum_j p[i, j] * rel_v[i, j, d]  (rel_v pre-transposed to (T, d, T))
    w2 = jnp.sum(p[:, None, :] * rvt_ref[...].astype(jnp.float32), axis=-1)

    o_ref[0] = (w1 + w2).astype(o_ref.dtype)


def rel_self_attention(x, src_mask, p, n_head, max_rel):
    b, t, c = x.shape
    d = c // n_head
    x2 = x.reshape(b * t, c)

    # Fused Q/K/V projection: one wide matmul instead of three kernel launches.
    wqkv = jnp.concatenate([p["wq"], p["wk"], p["wv"]], axis=1)     # (C, 3C)
    bqkv = jnp.concatenate([p["bq"], p["bk"], p["bv"]], axis=0)     # (3C,)
    qkv = linear(x2, wqkv, bqkv)                                    # (B*T, 3C)
    q, k, v = qkv[:, :c], qkv[:, c:2 * c], qkv[:, 2 * c:]

    def to_heads(z):
        return (z.reshape(b, t, n_head, d).transpose(0, 2, 1, 3)
                 .reshape(b * n_head, t, d))

    qh, kh, vh = to_heads(q), to_heads(k), to_heads(v)

    rel_k = relative_position(p["rel_k"], t, t, max_rel)      # (T, T, d)
    rel_v = relative_position(p["rel_v"], t, t, max_rel)      # (T, T, d)
    rel_v_t = jnp.transpose(rel_v, (0, 2, 1))                 # (T, d, T)

    if src_mask is None:
        mask_f = jnp.ones((b * n_head, t, t), jnp.float32)
    else:
        mask_f = (jnp.broadcast_to(src_mask, (b, n_head, t, t))
                    .reshape(b * n_head, t, t).astype(jnp.float32))

    y = pl.pallas_call(
        functools.partial(_rel_attn_kernel, scale=1.0 / math.sqrt(d)),
        out_shape=jax.ShapeDtypeStruct((b * n_head, t, d), x.dtype),
        grid=(b * n_head,),
        in_specs=[pl.BlockSpec((1, t, d), lambda i: (i, 0, 0)),
                  pl.BlockSpec((1, t, d), lambda i: (i, 0, 0)),
                  pl.BlockSpec((1, t, d), lambda i: (i, 0, 0)),
                  pl.BlockSpec((1, t, t), lambda i: (i, 0, 0)),
                  # constant block index -> rel tables stay resident in VMEM
                  pl.BlockSpec((t, t, d), lambda i: (0, 0, 0)),
                  pl.BlockSpec((t, d, t), lambda i: (0, 0, 0))],
        out_specs=pl.BlockSpec((1, t, d), lambda i: (i, 0, 0)),
        compiler_params=pltpu.CompilerParams(dimension_semantics=("parallel",)),
    )(qh, kh, vh, mask_f, rel_k, rel_v_t)

    y = y.reshape(b, n_head, t, d).transpose(0, 2, 1, 3).reshape(b * t, c)
    return linear(y, p["wp"], p["bp"]).reshape(b, t, c)


# ----------------------------------------------------------------------------
# Block / head forward
# ----------------------------------------------------------------------------
def block_forward(x, src_mask, p, n_head, max_rel):
    b, t, c = x.shape
    h = layer_norm(x.reshape(b * t, c), p["ln1_w"], p["ln1_b"]).reshape(b, t, c)
    x = x + rel_self_attention(h, src_mask, p, n_head, max_rel)

    h = layer_norm(x.reshape(b * t, c), p["ln2_w"], p["ln2_b"])
    h = linear(h, p["w1"], p["b1"])
    h = jax.nn.gelu(h, approximate=False)       # exact erf GELU, matches nn.GELU
    h = linear(h, p["w2"], p["b2"])
    return x + h.reshape(b, t, c)


def cross_cond_trans_head(x, src_mask, params, n_head, max_rel):
    for p in params["blocks"]:
        x = block_forward(x, src_mask, p, n_head, max_rel)
    b, t, c = x.shape
    h = layer_norm(x.reshape(b * t, c), params["lnf_w"], params["lnf_b"])
    logits = linear(h, params["head_w"], None)                  # head has no bias
    return logits.reshape(b, t, -1)


# ----------------------------------------------------------------------------
# Parameter init (mirrors CrossCondTransHead._init_weights)
# ----------------------------------------------------------------------------
def init_params(key, *, num_layers, embed_dim, n_head, fc_rate, num_vq, max_rel):
    d = embed_dim // n_head
    t = 2 * max_rel + 1
    keys = iter(jax.random.split(key, num_layers * 8 + 1))

    def lin_w(shape):  # nn.Linear weight ~ N(0, 0.02), stored as (in, out)
        return 0.02 * jax.random.normal(next(keys), shape, jnp.float32)

    def xavier(shape):  # RelativePosition table keeps its xavier_uniform init
        bound = math.sqrt(6.0 / (shape[0] + shape[1]))
        return jax.random.uniform(next(keys), shape, jnp.float32, -bound, bound)

    blocks = []
    for _ in range(num_layers):
        blocks.append(dict(
            ln1_w=jnp.ones((embed_dim,), jnp.float32),
            ln1_b=jnp.zeros((embed_dim,), jnp.float32),
            wq=lin_w((embed_dim, embed_dim)), bq=jnp.zeros((embed_dim,), jnp.float32),
            wk=lin_w((embed_dim, embed_dim)), bk=jnp.zeros((embed_dim,), jnp.float32),
            wv=lin_w((embed_dim, embed_dim)), bv=jnp.zeros((embed_dim,), jnp.float32),
            rel_k=xavier((t, d)), rel_v=xavier((t, d)),
            wp=lin_w((embed_dim, embed_dim)), bp=jnp.zeros((embed_dim,), jnp.float32),
            ln2_w=jnp.ones((embed_dim,), jnp.float32),
            ln2_b=jnp.zeros((embed_dim,), jnp.float32),
            w1=lin_w((embed_dim, fc_rate * embed_dim)),
            b1=jnp.zeros((fc_rate * embed_dim,), jnp.float32),
            w2=lin_w((fc_rate * embed_dim, embed_dim)),
            b2=jnp.zeros((embed_dim,), jnp.float32),
        ))
    return dict(blocks=blocks,
                lnf_w=jnp.ones((embed_dim,), jnp.float32),
                lnf_b=jnp.zeros((embed_dim,), jnp.float32),
                head_w=lin_w((embed_dim, num_vq)))


# ----------------------------------------------------------------------------
# Pure-JAX reference (mirrors the PyTorch math) for correctness checking
# ----------------------------------------------------------------------------
def _ref_relative_position(table, lq, lk, max_rel):
    dist = jnp.arange(lk)[None, :] - jnp.arange(lq)[:, None]
    idx = jnp.clip(dist, -max_rel, max_rel) + max_rel
    return table[idx]


def _ref_layer_norm(x, w, b, eps=1e-5):
    mu = jnp.mean(x, axis=-1, keepdims=True)
    var = jnp.mean((x - mu) ** 2, axis=-1, keepdims=True)
    return (x - mu) / jnp.sqrt(var + eps) * w + b


def _ref_attention(x, src_mask, p, n_head, max_rel):
    b, t, c = x.shape
    d = c // n_head
    q = x @ p["wq"] + p["bq"]
    k = x @ p["wk"] + p["bk"]
    v = x @ p["wv"] + p["bv"]
    r_q1 = q.reshape(b, t, n_head, d).transpose(0, 2, 1, 3)
    r_k1 = k.reshape(b, t, n_head, d).transpose(0, 2, 1, 3)
    attn1 = r_q1 @ r_k1.transpose(0, 1, 3, 2)
    r_q2 = q.transpose(1, 0, 2).reshape(t, b * n_head, d)
    r_k2 = _ref_relative_position(p["rel_k"], t, t, max_rel)
    attn2 = (r_q2 @ r_k2.transpose(0, 2, 1)).transpose(1, 0, 2).reshape(b, n_head, t, t)
    attn = (attn1 + attn2) / math.sqrt(d)
    if src_mask is not None:
        attn = jnp.where(src_mask, attn, -1e30)
    attn = jax.nn.softmax(attn, axis=-1)
    r_v1 = v.reshape(b, t, n_head, d).transpose(0, 2, 1, 3)
    w1 = attn @ r_v1
    r_v2 = _ref_relative_position(p["rel_v"], t, t, max_rel)
    w2 = attn.transpose(2, 0, 1, 3).reshape(t, b * n_head, t) @ r_v2
    w2 = w2.transpose(1, 0, 2).reshape(b, n_head, t, d)
    y = (w1 + w2).transpose(0, 2, 1, 3).reshape(b * t, c)
    return (y @ p["wp"] + p["bp"]).reshape(b, t, c)


def _ref_forward(x, src_mask, params, n_head, max_rel):
    b, t, c = x.shape
    for p in params["blocks"]:
        h = _ref_layer_norm(x, p["ln1_w"], p["ln1_b"])
        x = x + _ref_attention(h, src_mask, p, n_head, max_rel)
        h = _ref_layer_norm(x, p["ln2_w"], p["ln2_b"]).reshape(b * t, c)
        h = h @ p["w1"] + p["b1"]
        h = jax.nn.gelu(h, approximate=False)
        h = h @ p["w2"] + p["b2"]
        x = x + h.reshape(b, t, c)
    h = _ref_layer_norm(x, params["lnf_w"], params["lnf_b"]).reshape(b * t, c)
    return (h @ params["head_w"]).reshape(b, t, -1)


# ----------------------------------------------------------------------------
if __name__ == "__main__":
    B, T, C = 2, 8, 64
    n_head = 8
    num_layers = 2
    fc_rate = 4
    num_vq = 128
    block_size, time_cond = 16, 0
    max_rel = block_size + time_cond            # args.block_size + args.time_cond

    key = jax.random.PRNGKey(0)
    kx, kp = jax.random.split(key)
    x = jax.random.normal(kx, (B, T, C), jnp.float32)
    params = init_params(kp, num_layers=num_layers, embed_dim=C, n_head=n_head,
                         fc_rate=fc_rate, num_vq=num_vq, max_rel=max_rel)

    # src_mask: (B, n_head, T, T) bool, True = keep. Mask last 2 keys of batch 1.
    valid = jnp.array([T, T - 2])
    key_ok = jnp.arange(T)[None, :] < valid[:, None]            # (B, T)
    src_mask = jnp.broadcast_to(key_ok[:, None, None, :], (B, n_head, T, T))

    logits = cross_cond_trans_head(x, src_mask, params, n_head, max_rel)
    logits = jax.block_until_ready(logits)
    assert logits.shape == (B, T, num_vq)
    assert bool(jnp.all(jnp.isfinite(logits)))

    # Exact check of the RelativePosition kernel (pure copies/selects).
    rp = relative_position(params["blocks"][0]["rel_k"], T, T, max_rel)
    rp_ref = _ref_relative_position(params["blocks"][0]["rel_k"], T, T, max_rel)
    assert jnp.allclose(rp, rp_ref), "RelativePosition kernel mismatch"

    # End-to-end check vs pure-JAX reference of the full forward.
    ref = _ref_forward(x, src_mask, params, n_head, max_rel)
    assert jnp.allclose(logits, ref, atol=2e-2, rtol=2e-2), \
        "CrossCondTransHead forward mismatch vs reference"

    print("KERNEL_OK")
</pallas_src>

<mosaic_0001>
module attributes {stable_mosaic.version = 11 : i64} {
  func.func @_layernorm_kernel(%arg0: i32, %arg1: memref<16x64xf32, #tpu.memory_space<vmem>>, %arg2: memref<1x64xf32, #tpu.memory_space<vmem>>, %arg3: memref<1x64xf32, #tpu.memory_space<vmem>>, %arg4: memref<16x64xf32, #tpu.memory_space<vmem>>) attributes {dimension_semantics = [#tpu.dimension_semantics<parallel>], iteration_bounds = array<i64: 1>, scalar_prefetch = 0 : i64, scratch_operands = 0 : i64, tpu.core_type = #tpu.core_type<tc>, window_params = [{transform_indices = @transform_0, window_bounds = array<i64: 16, 64>}, {pipeline_mode = #tpu.pipeline_mode<synchronous>, transform_indices = @transform_1, window_bounds = array<i64: 1, 64>}, {pipeline_mode = #tpu.pipeline_mode<synchronous>, transform_indices = @transform_2, window_bounds = array<i64: 1, 64>}, {transform_indices = @transform_3, window_bounds = array<i64: 16, 64>}]} {
    %c0 = arith.constant 0 : index
    %c0_0 = arith.constant 0 : index
    %0 = vector.load %arg1[%c0, %c0_0] : memref<16x64xf32, #tpu.memory_space<vmem>>, vector<16x64xf32>
    %cst = arith.constant dense<0.000000e+00> : vector<16xf32>
    %1 = vector.multi_reduction <add>, %0, %cst [1] : vector<16x64xf32> to vector<16xf32>
    %2 = vector.shape_cast %1 : vector<16xf32> to vector<16x1xf32>
    %cst_1 = arith.constant 6.400000e+01 : f32
    %3 = vector.broadcast %cst_1 : f32 to vector<16x1xf32>
    %4 = arith.divf %2, %3 : vector<16x1xf32>
    %5 = vector.broadcast %4 : vector<16x1xf32> to vector<16x64xf32>
    %6 = arith.subf %0, %5 : vector<16x64xf32>
    %7 = arith.mulf %6, %6 : vector<16x64xf32>
    %cst_2 = arith.constant dense<0.000000e+00> : vector<16xf32>
    %8 = vector.multi_reduction <add>, %7, %cst_2 [1] : vector<16x64xf32> to vector<16xf32>
    %9 = vector.shape_cast %8 : vector<16xf32> to vector<16x1xf32>
    %cst_3 = arith.constant 6.400000e+01 : f32
    %10 = vector.broadcast %cst_3 : f32 to vector<16x1xf32>
    %11 = arith.divf %9, %10 : vector<16x1xf32>
    %cst_4 = arith.constant 9.99999974E-6 : f32
    %12 = vector.broadcast %cst_4 : f32 to vector<16x1xf32>
    %13 = arith.addf %11, %12 : vector<16x1xf32>
    %14 = math.rsqrt %13 : vector<16x1xf32>
    %15 = vector.broadcast %14 : vector<16x1xf32> to vector<16x64xf32>
    %16 = arith.mulf %6, %15 : vector<16x64xf32>
    %c0_5 = arith.constant 0 : index
    %c0_6 = arith.constant 0 : index
    %17 = vector.load %arg2[%c0_5, %c0_6] : memref<1x64xf32, #tpu.memory_space<vmem>>, vector<1x64xf32>
    %18 = vector.broadcast %17 : vector<1x64xf32> to vector<16x64xf32>
    %19 = arith.mulf %16, %18 : vector<16x64xf32>
    %c0_7 = arith.constant 0 : index
    %c0_8 = arith.constant 0 : index
    %20 = vector.load %arg3[%c0_7, %c0_8] : memref<1x64xf32, #tpu.memory_space<vmem>>, vector<1x64xf32>
    %21 = vector.broadcast %20 : vector<1x64xf32> to vector<16x64xf32>
    %22 = arith.addf %19, %21 : vector<16x64xf32>
    %c0_9 = arith.constant 0 : index
    %c0_10 = arith.constant 0 : index
    %23 = vector.load %arg4[%c0_9, %c0_10] : memref<16x64xf32, #tpu.memory_space<vmem>>, vector<16x64xf32>
    tpu.vector_store %arg4[%c0_9, %c0_10], %22 {strides = array<i32>} : memref<16x64xf32, #tpu.memory_space<vmem>>, vector<16x64xf32>,
    return
  }
  func.func @transform_0(%arg0: i32) -> (i32, i32) {
    %c0_i32 = arith.constant 0 : i32
    %c0_i32_0 = arith.constant 0 : i32
    return %arg0, %c0_i32 : i32, i32
  }
  func.func @transform_1(%arg0: i32) -> (i32, i32) {
    %c0_i32 = arith.constant 0 : i32
    %c0_i32_0 = arith.constant 0 : i32
    %c0_i32_1 = arith.constant 0 : i32
    return %c0_i32, %c0_i32_0 : i32, i32
  }
  func.func @transform_2(%arg0: i32) -> (i32, i32) {
    %c0_i32 = arith.constant 0 : i32
    %c0_i32_0 = arith.constant 0 : i32
    %c0_i32_1 = arith.constant 0 : i32
    return %c0_i32, %c0_i32_0 : i32, i32
  }
  func.func @transform_3(%arg0: i32) -> (i32, i32) {
    %c0_i32 = arith.constant 0 : i32
    %c0_i32_0 = arith.constant 0 : i32
    return %arg0, %c0_i32 : i32, i32
  }
}

</mosaic_0001>

<bundles_post_ra>
// kernel: tpu_custom_call.1
= control target key start
LH: loop header
LB: loop body
LE: loop exit
PB: predicated region body
PF: predicated region fallthrough
CT: control target
= control target key end

     0   :  { %8 = vsyncpa [#allocation3], 0  ;;  %s275_s0 = inlined_call_operand.hbm [shape: f32[16,64], index: 0, kind: input, shape index: {}]   ;;  %s276_s1 = inlined_call_operand.hbm [shape: f32[1,64], index: 1, kind: input, shape index: {}]   ;;  %s277_s2 = inlined_call_operand.vmem [shape: f32[1,64], index: 2, kind: input, shape index: {}]   ;;  %s278_s3 = inlined_call_operand.hbm [shape: f32[16,64], index: 3, kind: output, shape index: {}]  }
   0x1   :  { %9 = vsyncpa [#allocation6], 0 }
   0x2   :  { %10 = vsyncpa [#allocation4], 0  ;;  %s15_s14 = sshll.u32 %s275_s0, 4  ;;  %s225_s15 = smov [#allocation2]   ;;  %s16_s14 = int_to_ptr.hbm [resolvable:$true] %s15_s14 }
   0x3   :  { %s17_s16 = sshll.u32 %s225_s15, 4  ;;  %s29_s19 = sshll.u32 %s276_s1, 4  ;;  %s18_s16 = int_to_ptr.vmem [resolvable:$true] %s17_s16  ;;  %s30_s19 = int_to_ptr.hbm [resolvable:$true] %s29_s19 }
   0x4   :  { %s226_s20 = smov 128   ;;  %s227_s21 = smov 8  }
   0x5   :  { %23 = dma.hbm_to_vmem [thread:$0]  %s16_s14, 256, %s18_s16, [#allocation3], %s226_s20, %s226_s20, %s227_s21  }
   0x6   :  { %s228_s22 = smov [#allocation5]  }
   0x7   :  { %s31_s23 = sshll.u32 %s228_s22, 4  ;;  %s32_s23 = int_to_ptr.vmem [resolvable:$true] %s31_s23 }
   0x8   :  { %34 = dma.hbm_to_vmem [thread:$0]  %s30_s19, 16, %s32_s23, [#allocation6]  }
   0x9   :  { %219 = dma.done.wait [#allocation3], 256  }
   0xa   :  { %220 = vsyncadd [#allocation3], 4294967040 }
   0xb   :  { %221 = dma.done.wait [#allocation6], 16  }
   0xc   :  { %222 = vsyncadd [#allocation6], 4294967280  ;;  %vm47_vm0 = vcmask 523264   ;;  %v45_v0 = vld [vmem:[#allocation2] sm:$0xff]  ;;  %v46_v2 = vld [vmem:[#allocation2 + $0x8] sm:$0xff]  ;;  %v229_v4 = vmov 64.0  }
   0xd   :  { %v48_v1 = vsel %vm47_vm0, %v45_v0, 0.0  ;;  %v51_v3 = vsel %vm47_vm0, %v46_v2, 0.0  ;;  %141 = vrcp.f32 %v229_v4  ;;  %v139_v35 = vld [vmem:[#allocation5] ss:$0 sm:$0xff]  ;;  %v140_v39 = vld [vmem:[%s277_s2] ss:$0 sm:$0xff] }
   0xe   :  { %49 = vadd.xlane.f32.xlu0 %v48_v1  ;;  %s230_s24 = smov [#allocation7]   ;;  %s119_s28 = sshll.u32 %s278_s3, 4  ;;  %s120_s28 = int_to_ptr.hbm [resolvable:$true] %s119_s28 }
   0xf   :  { %s117_s25 = sshll.u32 %s230_s24, 4  ;;  %s118_s25 = int_to_ptr.vmem [resolvable:$true] %s117_s25 }
  0x13   :  { %v142_v5 = vpop.eup %141 }
  0x14   :  { %v55_v6 = vmul.f32 64.0, %v142_v5  ;;  %vm59_vm1 = vweird.f32 %v142_v5 }
  0x16   :  { %52 = vadd.xlane.f32.xlu0 %v51_v3  ;;  %v56_v7 = vsub.f32 1.0, %v55_v6 }
  0x18   :  { %v57_v8 = vmul.f32 %v142_v5, %v56_v7 }
  0x1a   :  { %v58_v9 = vadd.f32 %v142_v5, %v57_v8 }
  0x1c   :  { %v60_v10 = vsel %vm59_vm1, %v142_v5, %v58_v9 }
  0x81   :  { %v50_v11 = vpop.xlane.xlu0 %49 }
  0x82   :  { %v61_v12 = vmul.f32 %v60_v10, %v50_v11 }
  0x84   :  { %v63_v13 = vsub.f32 %v45_v0, %v61_v12 }
  0x86   :  { %v65_v14 = vmul.f32 %v63_v13, %v63_v13 }
  0x88   :  { %v67_v15 = vsel %vm47_vm0, %v65_v14, 0.0 }
  0x89   :  { %68 = vadd.xlane.f32.xlu1 %v67_v15  ;;  %v53_v16 = vpop.xlane.xlu0 %52 }
  0x8a   :  { %v62_v17 = vmul.f32 %v60_v10, %v53_v16 }
  0x8c   :  { %v64_v18 = vsub.f32 %v46_v2, %v62_v17 }
  0x8e   :  { %v66_v19 = vmul.f32 %v64_v18, %v64_v18 }
  0x90   :  { %v70_v20 = vsel %vm47_vm0, %v66_v19, 0.0 }
  0x91   :  { %71 = vadd.xlane.f32.xlu1 %v70_v20 }
  0xfc   :  { %v69_v21 = vpop.xlane.xlu1 %68 }
  0xfd   :  { %v73_v22 = vmul.f32 %v69_v21, %v60_v10 }
  0xff   :  { %v75_v23 = vadd.f32 1e-05, %v73_v22 }
 0x101   :  { %143 = vrsqrt.f32 %v75_v23  ;;  %vm83_vm3 = vweird.f32 %v75_v23 }
 0x104   :  { %v72_v24 = vpop.xlane.xlu1 %71 }
 0x105   :  { %v74_v25 = vmul.f32 %v72_v24, %v60_v10 }
 0x107   :  { %v144_v26 = vpop.eup %143  ;;  %v76_v27 = vadd.f32 1e-05, %v74_v25 }
 0x108   :  { %v78_v28 = vmul.f32 %v144_v26, %v75_v23  ;;  %vm84_vm2 = vweird.f32 %v144_v26 }
 0x109   :  { %145 = vrsqrt.f32 %v76_v27  ;;  %vm85_vm4 = vmor %vm83_vm3, %vm84_vm2  ;;  %vm93_vm6 = vweird.f32 %v76_v27 }
 0x10a   :  { %v79_v29 = vmul.f32 %v144_v26, %v78_v28 }
 0x10c   :  { %v80_v30 = vmul.f32 0.5, %v79_v29 }
 0x10e   :  { %v81_v31 = vsub.f32 1.5, %v80_v30 }
 0x10f   :  { %v146_v32 = vpop.eup %145 }
 0x110   :  { %v82_v33 = vmul.f32 %v144_v26, %v81_v31  ;;  %v88_v34 = vmul.f32 %v146_v32, %v76_v27  ;;  %vm94_vm5 = vweird.f32 %v146_v32 }
 0x111   :  { %vm95_vm7 = vmor %vm93_vm6, %vm94_vm5 }
 0x112   :  { %v86_v36 = vsel %vm85_vm4, %v144_v26, %v82_v33  ;;  %v89_v37 = vmul.f32 %v146_v32, %v88_v34 }
 0x113   :  { %v97_v38 = vmul.f32 %v86_v36, %v63_v13 }
 0x114   :  { %v90_v40 = vmul.f32 0.5, %v89_v37 }
 0x115   :  { %v103_v41 = vmul.f32 %v139_v35, %v97_v38 }
 0x116   :  { %v91_v42 = vsub.f32 1.5, %v90_v40 }
 0x117   :  { %v109_v43 = vadd.f32 %v140_v39, %v103_v41 }
 0x118   :  { %v92_v44 = vmul.f32 %v146_v32, %v91_v42 }
 0x119   :  { %111 = vst.msk [vmem:[#allocation7] sm:$0xff] %vm47_vm0, %v109_v43 }
 0x11a   :  { %v96_v45 = vsel %vm95_vm7, %v146_v32, %v92_v44 }
 0x11b   :  { %v98_v46 = vmul.f32 %v96_v45, %v64_v18 }
 0x11d   :  { %v104_v47 = vmul.f32 %v139_v35, %v98_v46 }
 0x11f   :  { %v110_v48 = vadd.f32 %v140_v39, %v104_v47 }
 0x121   :  { %112 = vst.msk [vmem:[#allocation7 + $0x8] sm:$0xff] %vm47_vm0, %v110_v48 }
 0x122   :  { %125 = dma.vmem_to_hbm [thread:$0]  %s118_s25, 256, %s120_s28, [#allocation4], %s226_s20, %s226_s20, %s227_s21  }
 0x123   :  { %223 = dma.done.wait [#allocation4], 256  }
 0x124   :  { %224 = vsyncadd [#allocation4], 4294967040 }
 0x125   :  { %130 = vsyncpa [#allocation3], 1 }
 0x126   :  { %131 = vsyncpa [#allocation6], 1 }
 0x127   :  { %132 = vsyncpa [#allocation4], 1 }

</bundles_post_ra>
